<compile_context>
chip_gen: v7x
topology: tpu7x:2x2x1
jax: 0.10.0
libtpu: 0.0.40
codegen_flags: <defaults>
</compile_context>

<pallas_src>
import functools

import jax
import jax.numpy as jnp
from jax.experimental import pallas as pl
from jax.experimental.pallas import tpu as pltpu

EPS = 1e-5


# --------------------------------------------------------------------------
# in-kernel helpers
# --------------------------------------------------------------------------
def _channel_fold(v, cout):
    """v: (1, W*C) f32.  Return (1, W*C) where every lane holds the total over
    all lanes of the same channel (lane % cout), i.e. per-channel sums already
    broadcast back into the packed (w, c) lane layout.  log2(W) XLU lane
    rolls; requires W to be a power of two (asserted in the wrapper)."""
    wc = v.shape[-1]
    shift = cout
    while shift < wc:
        v = v + pltpu.roll(v, shift=shift, axis=1)
        shift *= 2
    return v


def _bn_packed(acc, gamma_pk, beta_pk, cout, count):
    """Training-mode BatchNorm (biased variance, eps=1e-5) on packed (M, W*C)
    f32 activations.  Two-pass (mean, then centered second moment)."""
    inv = 1.0 / count
    mean = _channel_fold(jnp.sum(acc, axis=0, keepdims=True), cout) * inv
    d = acc - mean
    var = _channel_fold(jnp.sum(d * d, axis=0, keepdims=True), cout) * inv
    scale = gamma_pk * jax.lax.rsqrt(var + EPS)          # EUP rsqrt
    return d * scale + beta_pk                           # single FMA pass


def _conv_patch(pad_ref, h):
    """Concatenate the 3 H-shifted views of an H-padded (N, H+2, W*C) buffer
    into one (N*H, 3*W*C) bf16 patch, so the whole 3x3 conv becomes a single
    MXU dot (kh and kw both folded into K)."""
    n, _, wc = pad_ref.shape
    p = jnp.concatenate(
        [pad_ref[:, 0:h, :], pad_ref[:, 1:1 + h, :], pad_ref[:, 2:2 + h, :]],
        axis=-1)                                          # (N, H, 3*W*C)
    return p.reshape(n * h, 3 * wc).astype(jnp.bfloat16)  # one bf16 cast / conv


def basic_block_kernel(cout, xpad_ref, w1_ref, w2_ref, g1_ref, b1_ref,
                       g2_ref, b2_ref, out_ref, ypad_ref):
    # xpad_ref: (N, H+2, W*Cin)   f32 lane-dense packed, H-padded input
    # w*_ref:   (3*W*Cin, W*Cout) bf16 banded conv matrix (kh folded into K)
    # g*/b*:    (1, W*Cout)       f32 BN affine params tiled into packed layout
    # out_ref:  (N, H, W*Cout)    f32
    # ypad_ref: (N, H+2, W*Cout)  f32 VMEM scratch for the conv2 input
    n, hp2, wc = xpad_ref.shape
    h = hp2 - 2
    m = n * h
    w = wc // cout
    count = float(m * w)                                  # N*H*W per channel

    # ---- conv1 -> bn1 -> relu  (single K=3*W*Cin MXU dot) ----
    patch1 = _conv_patch(xpad_ref, h)
    acc1 = jnp.dot(patch1, w1_ref[...], preferred_element_type=jnp.float32)
    y = jnp.maximum(_bn_packed(acc1, g1_ref[...], b1_ref[...], cout, count), 0.0)

    # ---- stage H-padded conv1 output: zero only the 2 halo rows,
    #      write the interior exactly once ----
    zero_row = jnp.zeros((n, 1, wc), jnp.float32)
    ypad_ref[:, 0:1, :] = zero_row
    ypad_ref[:, h + 1:h + 2, :] = zero_row
    ypad_ref[:, 1:1 + h, :] = y.reshape(n, h, wc)
    # TODO(synk): a bf16 scratch would halve this traffic once bf16
    #             odd-sublane-offset stores are exercised/validated here.

    # ---- conv2 -> bn2 ----
    patch2 = _conv_patch(ypad_ref, h)
    acc2 = jnp.dot(patch2, w2_ref[...], preferred_element_type=jnp.float32)
    z = _bn_packed(acc2, g2_ref[...], b2_ref[...], cout, count)

    # ---- residual (interior of the padded input) + relu, lane-dense store ----
    res = xpad_ref[:, 1:1 + h, :].reshape(m, wc)
    out_ref[...] = jnp.maximum(z + res, 0.0).reshape(n, h, wc)


# --------------------------------------------------------------------------
# one-time parameter packing (outside the per-call path)
# --------------------------------------------------------------------------
def _pack_conv3x3(w_hwio, w_spatial):
    """Fold kh, kw taps + W-direction SAME padding of a 3x3 conv into a single
    (3*W*Cin, W*Cout) bf16 matrix (block-rows ordered kh=0,1,2 to match the
    patch layout produced by _conv_patch)."""
    kh_n, kw_n, cin, cout = w_hwio.shape
    wq = w_hwio.astype(jnp.bfloat16).astype(jnp.float32)  # match in-kernel bf16 taps
    blocks = []
    for kh in range(kh_n):
        mat = jnp.zeros((w_spatial, cin, w_spatial, cout), jnp.float32)
        for kw in range(kw_n):
            # band[w_in, w_out] = 1  iff  w_in == w_out + kw - 1 (OOB cols absent)
            band = jnp.eye(w_spatial, w_spatial, k=1 - kw, dtype=jnp.float32)
            mat = mat + jnp.einsum('pq,io->piqo', band, wq[kh, kw])
        blocks.append(mat.reshape(w_spatial * cin, w_spatial * cout))
    return jnp.concatenate(blocks, axis=0).astype(jnp.bfloat16)


def prepare_block_params(w1, w2, g1, b1, g2, b2, w_spatial):
    """Pack conv weights and BN affine params ONCE; reuse across forward calls."""
    cout = w1.shape[-1]
    wc = w_spatial * cout

    def tile(v):
        return jnp.tile(v.astype(jnp.float32), w_spatial).reshape(1, wc)

    return (_pack_conv3x3(w1, w_spatial), _pack_conv3x3(w2, w_spatial),
            tile(g1), tile(b1), tile(g2), tile(b2))


# --------------------------------------------------------------------------
# forward wrapper
# --------------------------------------------------------------------------
@jax.jit
def basic_block_fwd(x_nchw, params):
    """BasicBlock forward.  x_nchw: (N, C, H, W) like PyTorch; params from
    prepare_block_params."""
    w1m, w2m, g1p, b1p, g2p, b2p = params
    n, cin, h, w = x_nchw.shape
    wc = w1m.shape[-1]
    cout = wc // w
    # stride=1 / downsample=None => identity residual requires inplanes == planes.
    assert cin == cout, "identity residual requires inplanes == planes"
    assert w > 0 and (w & (w - 1)) == 0, "W must be a power of two (lane-roll BN fold)"
    assert wc == 128, "small-shape kernel assumes W*C == 128 (one full lane row)"

    # NCHW -> lane-dense packed (N, H, W*C), H-padded by one row each side in
    # the wrapper so the kernel never copies the input before conv1.
    # TODO(synk): keep activations packed (and bf16) end-to-end across blocks
    #             instead of paying this transpose + pad per block.
    x_packed = jnp.transpose(x_nchw, (0, 2, 3, 1)).reshape(n, h, wc).astype(jnp.float32)
    xpad = jnp.pad(x_packed, ((0, 0), (1, 1), (0, 0)))

    inputs = (xpad, w1m, w2m, g1p, b1p, g2p, b2p)

    flops = 2 * 2 * (n * h) * (3 * wc) * wc               # two K=3*W*C MXU dots
    bytes_accessed = (sum(int(a.size) * a.dtype.itemsize for a in inputs)
                      + n * h * wc * 4)
    resident = bytes_accessed + n * (h + 2) * wc * 4      # + f32 scratch
    # Cap at the 32 MiB scoped default (not 64 MiB == v7x physical VMEM).
    vmem_limit = int(min(max(4 * resident, 4 * 1024 * 1024), 32 * 1024 * 1024))

    out_packed = pl.pallas_call(
        functools.partial(basic_block_kernel, cout),
        out_shape=jax.ShapeDtypeStruct((n, h, wc), jnp.float32),
        in_specs=[pl.BlockSpec(memory_space=pltpu.MemorySpace.VMEM)] * len(inputs),
        out_specs=pl.BlockSpec(memory_space=pltpu.MemorySpace.VMEM),
        scratch_shapes=[pltpu.VMEM((n, h + 2, wc), jnp.float32)],
        compiler_params=pltpu.CompilerParams(vmem_limit_bytes=vmem_limit),
        cost_estimate=pl.CostEstimate(flops=flops, transcendentals=2 * wc,
                                      bytes_accessed=bytes_accessed),
    )(*inputs)

    # unpack (N, H, W*C) -> NCHW
    return jnp.transpose(out_packed.reshape(n, h, w, cout), (0, 3, 1, 2))


# --------------------------------------------------------------------------
# pure-JAX reference (same bf16 conv-input quantization, f32 accumulation)
# --------------------------------------------------------------------------
def reference_basic_block(x_nchw, w1, w2, g1, b1, g2, b2):
    x = jnp.transpose(x_nchw, (0, 2, 3, 1)).astype(jnp.float32)

    def conv(v, wgt):
        return jax.lax.conv_general_dilated(
            v.astype(jnp.bfloat16), wgt.astype(jnp.bfloat16),
            window_strides=(1, 1), padding="SAME",
            dimension_numbers=("NHWC", "HWIO", "NHWC"),
            preferred_element_type=jnp.float32)

    def bn(v, g, b):
        m = jnp.mean(v, axis=(0, 1, 2), keepdims=True)
        var = jnp.mean((v - m) ** 2, axis=(0, 1, 2), keepdims=True)
        return (v - m) * jax.lax.rsqrt(var + EPS) * g + b

    y = jax.nn.relu(bn(conv(x, w1), g1, b1))
    z = jax.nn.relu(bn(conv(y, w2), g2, b2) + x)
    return jnp.transpose(z, (0, 3, 1, 2))


if __name__ == "__main__":
    # Small shapes consistent with BasicBlock(inplanes=8, planes=8, stride=1).
    # W * C = 128 -> exactly one full lane row per (n, h).
    N, C, H, W = 2, 8, 16, 16
    key = jax.random.PRNGKey(0)
    kx, k1, k2, kg1, kb1, kg2, kb2 = jax.random.split(key, 7)

    x = jax.random.normal(kx, (N, C, H, W), jnp.float32)            # NCHW input
    w1 = 0.2 * jax.random.normal(k1, (3, 3, C, C), jnp.float32)     # HWIO
    w2 = 0.2 * jax.random.normal(k2, (3, 3, C, C), jnp.float32)     # HWIO
    g1 = 1.0 + 0.3 * jax.random.normal(kg1, (C,), jnp.float32)      # bn1 gamma
    b1 = 0.1 * jax.random.normal(kb1, (C,), jnp.float32)            # bn1 beta
    g2 = 1.0 + 0.3 * jax.random.normal(kg2, (C,), jnp.float32)      # bn2 gamma
    b2 = 0.1 * jax.random.normal(kb2, (C,), jnp.float32)            # bn2 beta

    # Pack parameters once (not on every forward call).
    params = jax.tree_util.tree_map(
        jax.block_until_ready, prepare_block_params(w1, w2, g1, b1, g2, b2, W))

    out = jax.block_until_ready(basic_block_fwd(x, params))
    ref = jax.block_until_ready(reference_basic_block(x, w1, w2, g1, b1, g2, b2))

    assert out.shape == (N, C, H, W)
    max_diff = jnp.max(jnp.abs(out - ref))
    assert jnp.allclose(out, ref, atol=3e-2, rtol=3e-2), f"max abs diff {max_diff}"

    print("KERNEL_OK")
</pallas_src>

<mosaic_0001>
module attributes {stable_mosaic.version = 11 : i64} {
  func.func @basic_block_kernel(%arg0: memref<2x18x128xf32, #tpu.memory_space<vmem>>, %arg1: memref<384x128xbf16, #tpu.memory_space<vmem>>, %arg2: memref<384x128xbf16, #tpu.memory_space<vmem>>, %arg3: memref<1x128xf32, #tpu.memory_space<vmem>>, %arg4: memref<1x128xf32, #tpu.memory_space<vmem>>, %arg5: memref<1x128xf32, #tpu.memory_space<vmem>>, %arg6: memref<1x128xf32, #tpu.memory_space<vmem>>, %arg7: memref<2x16x128xf32, #tpu.memory_space<vmem>>, %arg8: memref<2x18x128xf32, #tpu.memory_space<vmem>>) attributes {dimension_semantics = [], scalar_prefetch = 0 : i64, scratch_operands = 1 : i64, tpu.core_type = #tpu.core_type<tc>} {
    %c0 = arith.constant 0 : index
    %c0_0 = arith.constant 0 : index
    %c0_1 = arith.constant 0 : index
    %0 = vector.load %arg0[%c0, %c0_0, %c0_1] : memref<2x18x128xf32, #tpu.memory_space<vmem>>, vector<2x16x128xf32>
    %c0_2 = arith.constant 0 : index
    %c1 = arith.constant 1 : index
    %c0_3 = arith.constant 0 : index
    %1 = vector.load %arg0[%c0_2, %c1, %c0_3] : memref<2x18x128xf32, #tpu.memory_space<vmem>>, vector<2x16x128xf32>
    %c0_4 = arith.constant 0 : index
    %c2 = arith.constant 2 : index
    %c0_5 = arith.constant 0 : index
    %2 = vector.load %arg0[%c0_4, %c2, %c0_5] : memref<2x18x128xf32, #tpu.memory_space<vmem>>, vector<2x16x128xf32>
    %3 = tpu.concatenate %0, %1, %2 in 2 : vector<2x16x128xf32>, vector<2x16x128xf32>, vector<2x16x128xf32> -> vector<2x16x384xf32>
    %4 = vector.shape_cast %3 : vector<2x16x384xf32> to vector<32x384xf32>
    %5 = arith.truncf %4 : vector<32x384xf32> to vector<32x384xbf16>
    %c0_6 = arith.constant 0 : index
    %c0_7 = arith.constant 0 : index
    %6 = vector.load %arg1[%c0_6, %c0_7] : memref<384x128xbf16, #tpu.memory_space<vmem>>, vector<384x128xbf16>
    %cst = arith.constant dense<0.000000e+00> : vector<32x128xf32>
    %7 = tpu.matmul %5, %6, %cst {dimension_numbers = #tpu.dot_dimension_numbers<[1], [0], [0], [1], [0, 0, 1, 1], [], []>} : vector<32x384xbf16>, vector<384x128xbf16>, vector<32x128xf32> -> vector<32x128xf32>
    %c0_8 = arith.constant 0 : index
    %c0_9 = arith.constant 0 : index
    %8 = vector.load %arg3[%c0_8, %c0_9] : memref<1x128xf32, #tpu.memory_space<vmem>>, vector<1x128xf32>
    %c0_10 = arith.constant 0 : index
    %c0_11 = arith.constant 0 : index
    %9 = vector.load %arg4[%c0_10, %c0_11] : memref<1x128xf32, #tpu.memory_space<vmem>>, vector<1x128xf32>
    %cst_12 = arith.constant dense<0.000000e+00> : vector<128xf32>
    %10 = vector.multi_reduction <add>, %7, %cst_12 [0] : vector<32x128xf32> to vector<128xf32>
    %11 = vector.shape_cast %10 : vector<128xf32> to vector<1x128xf32>
    %c8_i32 = arith.constant 8 : i32
    %12 = tpu.dynamic_rotate %11 by %c8_i32 dim 1 : vector<1x128xf32>, i32 -> vector<1x128xf32>
    %13 = arith.addf %11, %12 : vector<1x128xf32>
    %c16_i32 = arith.constant 16 : i32
    %14 = tpu.dynamic_rotate %13 by %c16_i32 dim 1 : vector<1x128xf32>, i32 -> vector<1x128xf32>
    %15 = arith.addf %13, %14 : vector<1x128xf32>
    %c32_i32 = arith.constant 32 : i32
    %16 = tpu.dynamic_rotate %15 by %c32_i32 dim 1 : vector<1x128xf32>, i32 -> vector<1x128xf32>
    %17 = arith.addf %15, %16 : vector<1x128xf32>
    %c64_i32 = arith.constant 64 : i32
    %18 = tpu.dynamic_rotate %17 by %c64_i32 dim 1 : vector<1x128xf32>, i32 -> vector<1x128xf32>
    %19 = arith.addf %17, %18 : vector<1x128xf32>
    %cst_13 = arith.constant 0.001953125 : f32
    %20 = vector.broadcast %cst_13 : f32 to vector<1x128xf32>
    %21 = arith.mulf %19, %20 : vector<1x128xf32>
    %22 = vector.broadcast %21 : vector<1x128xf32> to vector<32x128xf32>
    %23 = arith.subf %7, %22 : vector<32x128xf32>
    %24 = arith.mulf %23, %23 : vector<32x128xf32>
    %cst_14 = arith.constant dense<0.000000e+00> : vector<128xf32>
    %25 = vector.multi_reduction <add>, %24, %cst_14 [0] : vector<32x128xf32> to vector<128xf32>
    %26 = vector.shape_cast %25 : vector<128xf32> to vector<1x128xf32>
    %c8_i32_15 = arith.constant 8 : i32
    %27 = tpu.dynamic_rotate %26 by %c8_i32_15 dim 1 : vector<1x128xf32>, i32 -> vector<1x128xf32>
    %28 = arith.addf %26, %27 : vector<1x128xf32>
    %c16_i32_16 = arith.constant 16 : i32
    %29 = tpu.dynamic_rotate %28 by %c16_i32_16 dim 1 : vector<1x128xf32>, i32 -> vector<1x128xf32>
    %30 = arith.addf %28, %29 : vector<1x128xf32>
    %c32_i32_17 = arith.constant 32 : i32
    %31 = tpu.dynamic_rotate %30 by %c32_i32_17 dim 1 : vector<1x128xf32>, i32 -> vector<1x128xf32>
    %32 = arith.addf %30, %31 : vector<1x128xf32>
    %c64_i32_18 = arith.constant 64 : i32
    %33 = tpu.dynamic_rotate %32 by %c64_i32_18 dim 1 : vector<1x128xf32>, i32 -> vector<1x128xf32>
    %34 = arith.addf %32, %33 : vector<1x128xf32>
    %cst_19 = arith.constant 0.001953125 : f32
    %35 = vector.broadcast %cst_19 : f32 to vector<1x128xf32>
    %36 = arith.mulf %34, %35 : vector<1x128xf32>
    %cst_20 = arith.constant 9.99999974E-6 : f32
    %37 = vector.broadcast %cst_20 : f32 to vector<1x128xf32>
    %38 = arith.addf %36, %37 : vector<1x128xf32>
    %39 = math.rsqrt %38 : vector<1x128xf32>
    %40 = arith.mulf %8, %39 : vector<1x128xf32>
    %41 = vector.broadcast %40 : vector<1x128xf32> to vector<32x128xf32>
    %42 = arith.mulf %23, %41 : vector<32x128xf32>
    %43 = vector.broadcast %9 : vector<1x128xf32> to vector<32x128xf32>
    %44 = arith.addf %42, %43 : vector<32x128xf32>
    %cst_21 = arith.constant 0.000000e+00 : f32
    %45 = vector.broadcast %cst_21 : f32 to vector<32x128xf32>
    %46 = arith.maximumf %44, %45 : vector<32x128xf32>
    %cst_22 = arith.constant 0.000000e+00 : f32
    %47 = vector.broadcast %cst_22 : f32 to vector<2x1x128xf32>
    %c0_23 = arith.constant 0 : index
    %c0_24 = arith.constant 0 : index
    %c0_25 = arith.constant 0 : index
    %48 = vector.load %arg8[%c0_23, %c0_24, %c0_25] : memref<2x18x128xf32, #tpu.memory_space<vmem>>, vector<2x1x128xf32>
    tpu.vector_store %arg8[%c0_23, %c0_24, %c0_25], %47 {strides = array<i32>} : memref<2x18x128xf32, #tpu.memory_space<vmem>>, vector<2x1x128xf32>,
    %c0_26 = arith.constant 0 : index
    %c17 = arith.constant 17 : index
    %c0_27 = arith.constant 0 : index
    %49 = vector.load %arg8[%c0_26, %c17, %c0_27] : memref<2x18x128xf32, #tpu.memory_space<vmem>>, vector<2x1x128xf32>
    tpu.vector_store %arg8[%c0_26, %c17, %c0_27], %47 {strides = array<i32>} : memref<2x18x128xf32, #tpu.memory_space<vmem>>, vector<2x1x128xf32>,
    %50 = vector.shape_cast %46 : vector<32x128xf32> to vector<2x16x128xf32>
    %c0_28 = arith.constant 0 : index
    %c1_29 = arith.constant 1 : index
    %c0_30 = arith.constant 0 : index
    %51 = vector.load %arg8[%c0_28, %c1_29, %c0_30] : memref<2x18x128xf32, #tpu.memory_space<vmem>>, vector<2x16x128xf32>
    tpu.vector_store %arg8[%c0_28, %c1_29, %c0_30], %50 {strides = array<i32>} : memref<2x18x128xf32, #tpu.memory_space<vmem>>, vector<2x16x128xf32>,
    %c0_31 = arith.constant 0 : index
    %c0_32 = arith.constant 0 : index
    %c0_33 = arith.constant 0 : index
    %52 = vector.load %arg8[%c0_31, %c0_32, %c0_33] : memref<2x18x128xf32, #tpu.memory_space<vmem>>, vector<2x16x128xf32>
    %c0_34 = arith.constant 0 : index
    %c1_35 = arith.constant 1 : index
    %c0_36 = arith.constant 0 : index
    %53 = vector.load %arg8[%c0_34, %c1_35, %c0_36] : memref<2x18x128xf32, #tpu.memory_space<vmem>>, vector<2x16x128xf32>
    %c0_37 = arith.constant 0 : index
    %c2_38 = arith.constant 2 : index
    %c0_39 = arith.constant 0 : index
    %54 = vector.load %arg8[%c0_37, %c2_38, %c0_39] : memref<2x18x128xf32, #tpu.memory_space<vmem>>, vector<2x16x128xf32>
    %55 = tpu.concatenate %52, %53, %54 in 2 : vector<2x16x128xf32>, vector<2x16x128xf32>, vector<2x16x128xf32> -> vector<2x16x384xf32>
    %56 = vector.shape_cast %55 : vector<2x16x384xf32> to vector<32x384xf32>
    %57 = arith.truncf %56 : vector<32x384xf32> to vector<32x384xbf16>
    %c0_40 = arith.constant 0 : index
    %c0_41 = arith.constant 0 : index
    %58 = vector.load %arg2[%c0_40, %c0_41] : memref<384x128xbf16, #tpu.memory_space<vmem>>, vector<384x128xbf16>
    %cst_42 = arith.constant dense<0.000000e+00> : vector<32x128xf32>
    %59 = tpu.matmul %57, %58, %cst_42 {dimension_numbers = #tpu.dot_dimension_numbers<[1], [0], [0], [1], [0, 0, 1, 1], [], []>} : vector<32x384xbf16>, vector<384x128xbf16>, vector<32x128xf32> -> vector<32x128xf32>
    %c0_43 = arith.constant 0 : index
    %c0_44 = arith.constant 0 : index
    %60 = vector.load %arg5[%c0_43, %c0_44] : memref<1x128xf32, #tpu.memory_space<vmem>>, vector<1x128xf32>
    %c0_45 = arith.constant 0 : index
    %c0_46 = arith.constant 0 : index
    %61 = vector.load %arg6[%c0_45, %c0_46] : memref<1x128xf32, #tpu.memory_space<vmem>>, vector<1x128xf32>
    %cst_47 = arith.constant dense<0.000000e+00> : vector<128xf32>
    %62 = vector.multi_reduction <add>, %59, %cst_47 [0] : vector<32x128xf32> to vector<128xf32>
    %63 = vector.shape_cast %62 : vector<128xf32> to vector<1x128xf32>
    %c8_i32_48 = arith.constant 8 : i32
    %64 = tpu.dynamic_rotate %63 by %c8_i32_48 dim 1 : vector<1x128xf32>, i32 -> vector<1x128xf32>
    %65 = arith.addf %63, %64 : vector<1x128xf32>
    %c16_i32_49 = arith.constant 16 : i32
    %66 = tpu.dynamic_rotate %65 by %c16_i32_49 dim 1 : vector<1x128xf32>, i32 -> vector<1x128xf32>
    %67 = arith.addf %65, %66 : vector<1x128xf32>
    %c32_i32_50 = arith.constant 32 : i32
    %68 = tpu.dynamic_rotate %67 by %c32_i32_50 dim 1 : vector<1x128xf32>, i32 -> vector<1x128xf32>
    %69 = arith.addf %67, %68 : vector<1x128xf32>
    %c64_i32_51 = arith.constant 64 : i32
    %70 = tpu.dynamic_rotate %69 by %c64_i32_51 dim 1 : vector<1x128xf32>, i32 -> vector<1x128xf32>
    %71 = arith.addf %69, %70 : vector<1x128xf32>
    %cst_52 = arith.constant 0.001953125 : f32
    %72 = vector.broadcast %cst_52 : f32 to vector<1x128xf32>
    %73 = arith.mulf %71, %72 : vector<1x128xf32>
    %74 = vector.broadcast %73 : vector<1x128xf32> to vector<32x128xf32>
    %75 = arith.subf %59, %74 : vector<32x128xf32>
    %76 = arith.mulf %75, %75 : vector<32x128xf32>
    %cst_53 = arith.constant dense<0.000000e+00> : vector<128xf32>
    %77 = vector.multi_reduction <add>, %76, %cst_53 [0] : vector<32x128xf32> to vector<128xf32>
    %78 = vector.shape_cast %77 : vector<128xf32> to vector<1x128xf32>
    %c8_i32_54 = arith.constant 8 : i32
    %79 = tpu.dynamic_rotate %78 by %c8_i32_54 dim 1 : vector<1x128xf32>, i32 -> vector<1x128xf32>
    %80 = arith.addf %78, %79 : vector<1x128xf32>
    %c16_i32_55 = arith.constant 16 : i32
    %81 = tpu.dynamic_rotate %80 by %c16_i32_55 dim 1 : vector<1x128xf32>, i32 -> vector<1x128xf32>
    %82 = arith.addf %80, %81 : vector<1x128xf32>
    %c32_i32_56 = arith.constant 32 : i32
    %83 = tpu.dynamic_rotate %82 by %c32_i32_56 dim 1 : vector<1x128xf32>, i32 -> vector<1x128xf32>
    %84 = arith.addf %82, %83 : vector<1x128xf32>
    %c64_i32_57 = arith.constant 64 : i32
    %85 = tpu.dynamic_rotate %84 by %c64_i32_57 dim 1 : vector<1x128xf32>, i32 -> vector<1x128xf32>
    %86 = arith.addf %84, %85 : vector<1x128xf32>
    %cst_58 = arith.constant 0.001953125 : f32
    %87 = vector.broadcast %cst_58 : f32 to vector<1x128xf32>
    %88 = arith.mulf %86, %87 : vector<1x128xf32>
    %cst_59 = arith.constant 9.99999974E-6 : f32
    %89 = vector.broadcast %cst_59 : f32 to vector<1x128xf32>
    %90 = arith.addf %88, %89 : vector<1x128xf32>
    %91 = math.rsqrt %90 : vector<1x128xf32>
    %92 = arith.mulf %60, %91 : vector<1x128xf32>
    %93 = vector.broadcast %92 : vector<1x128xf32> to vector<32x128xf32>
    %94 = arith.mulf %75, %93 : vector<32x128xf32>
    %95 = vector.broadcast %61 : vector<1x128xf32> to vector<32x128xf32>
    %96 = arith.addf %94, %95 : vector<32x128xf32>
    %c0_60 = arith.constant 0 : index
    %c1_61 = arith.constant 1 : index
    %c0_62 = arith.constant 0 : index
    %97 = vector.load %arg0[%c0_60, %c1_61, %c0_62] : memref<2x18x128xf32, #tpu.memory_space<vmem>>, vector<2x16x128xf32>
    %98 = vector.shape_cast %97 : vector<2x16x128xf32> to vector<32x128xf32>
    %99 = arith.addf %96, %98 : vector<32x128xf32>
    %cst_63 = arith.constant 0.000000e+00 : f32
    %100 = vector.broadcast %cst_63 : f32 to vector<32x128xf32>
    %101 = arith.maximumf %99, %100 : vector<32x128xf32>
    %102 = vector.shape_cast %101 : vector<32x128xf32> to vector<2x16x128xf32>
    %c0_64 = arith.constant 0 : index
    %c0_65 = arith.constant 0 : index
    %c0_66 = arith.constant 0 : index
    %103 = vector.load %arg7[%c0_64, %c0_65, %c0_66] : memref<2x16x128xf32, #tpu.memory_space<vmem>>, vector<2x16x128xf32>
    tpu.vector_store %arg7[%c0_64, %c0_65, %c0_66], %102 {strides = array<i32>} : memref<2x16x128xf32, #tpu.memory_space<vmem>>, vector<2x16x128xf32>,
    return
  }
}

</mosaic_0001>

<bundles_post_ra>
// kernel: basic_block_fwd.1
= control target key start
LH: loop header
LB: loop body
LE: loop exit
PB: predicated region body
PF: predicated region fallthrough
CT: control target
= control target key end

     0   :  { %s1061_s26 = smov 16   ;;  %s1062_s27 = smov 32   ;;  %s1367_s1 = inlined_call_operand.vmem [shape: bf16[384,128], index: 1, kind: input, shape index: {}]   ;;  %s1368_s0 = inlined_call_operand.vmem [shape: f32[2,18,128], index: 0, kind: input, shape index: {}]   ;;  %s1369_s2 = inlined_call_operand.vmem [shape: bf16[384,128], index: 2, kind: input, shape index: {}]   ;;  %s1370_s3 = inlined_call_operand.vmem [shape: f32[1,128], index: 3, kind: input, shape index: {}]   ;;  %s1371_s4 = inlined_call_operand.vmem [shape: f32[1,128], index: 4, kind: input, shape index: {}]   ;;  %s1372_s5 = inlined_call_operand.vmem [shape: f32[1,128], index: 5, kind: input, shape index: {}]   ;;  %s1373_s6 = inlined_call_operand.vmem [shape: f32[1,128], index: 6, kind: input, shape index: {}]   ;;  %s1374_s7 = inlined_call_operand.vmem [shape: f32[2,16,128], index: 7, kind: output, shape index: {}]  }
   0x1   :  { %v1008_v0 = vld [vmem:[%s1367_s1 + $0x40] sm:$0xff]   ;;  %v1011_v3 = vld [vmem:[%s1367_s1 + $0x48] sm:$0xff]   ;;  %v1014_v6 = vld [vmem:[%s1367_s1 + $0x50] sm:$0xff]   ;;  %s1063_s28 = smov 64  }
   0x2   :  { %v1009_v1 = vld [vmem:[%s1367_s1] sm:$0xff]   ;;  %887 = vmatprep.subr.bf16.mxu0 %v1008_v0  ;;  %v1012_v4 = vld [vmem:[%s1367_s1 + $0x8] sm:$0xff]   ;;  %v1015_v7 = vld [vmem:[%s1367_s1 + $0x10] sm:$0xff]  }
   0x3   :  { %v1010_v2 = vld [vmem:[%s1367_s1 + $0x80] sm:$0xff]   ;;  %888 = vmatpush3.bf16.msra.mxu0 %v1009_v1  ;;  %v1013_v5 = vld [vmem:[%s1367_s1 + $0x88] sm:$0xff]   ;;  %v1016_v8 = vld [vmem:[%s1367_s1 + $0x90] sm:$0xff]  }
   0x4   :  { %963 = vmatprep.subr.bf16.mxu1 %v1010_v2  ;;  %889 = vmatprep.subr.bf16.mxu0 %v1011_v3  ;;  %v1017_v9 = vld [vmem:[%s1367_s1 + $0x58] sm:$0xff]   ;;  %v1020_v12 = vld [vmem:[%s1367_s1 + $0x60] sm:$0xff]   ;;  %v1023_v15 = vld [vmem:[%s1367_s1 + $0x68] sm:$0xff]  }
   0x5   :  { %964 = vmatpush3.bf16.msra.mxu1 %v1010_v2  ;;  %v1018_v10 = vld [vmem:[%s1367_s1 + $0x18] sm:$0xff]   ;;  %v1022_v13 = vld [vmem:[%s1367_s1 + $0xa0] sm:$0xff]   ;;  %v1025_v16 = vld [vmem:[%s1367_s1 + $0xa8] sm:$0xff]  }
   0x6   :  { %965 = vmatprep.subr.bf16.mxu1 %v1013_v5  ;;  %v1019_v11 = vld [vmem:[%s1367_s1 + $0x98] sm:$0xff]   ;;  %v1021_v14 = vld [vmem:[%s1367_s1 + $0x20] sm:$0xff]   ;;  %v1024_v17 = vld [vmem:[%s1367_s1 + $0x28] sm:$0xff]  }
   0x7   :  { %890 = vmatpush3.bf16.msra.mxu0 %v1012_v4  ;;  %v1026_v18 = vld [vmem:[%s1367_s1 + $0x70] sm:$0xff]   ;;  %v1029_v21 = vld [vmem:[%s1367_s1 + $0x78] sm:$0xff]   ;;  %v1174_v22 = vld [vmem:[%s1368_s0 + $0x1] sm:$0xff] }
   0x8   :  { %891 = vmatprep.subr.bf16.mxu0 %v1014_v6  ;;  %v1028_v19 = vld [vmem:[%s1367_s1 + $0xb0] sm:$0xff]   ;;  %v35_v25 = vld [vmem:[%s1368_s0 + $0x2] sm:$0xff]  ;;  %v1031_v27 = vld [vmem:[%s1367_s1 + $0xb8] sm:$0xff]  }
   0x9   :  { %966 = vmatpush3.bf16.msra.mxu1 %v1013_v5  ;;  %v1027_v20 = vld [vmem:[%s1367_s1 + $0x30] sm:$0xff]   ;;  %v1030_v29 = vld [vmem:[%s1367_s1 + $0x38] sm:$0xff]   ;;  %v27_v30 = vld [vmem:[%s1368_s0] sm:$0xff] }
   0xa   :  { %967 = vmatprep.subr.bf16.mxu1 %v1016_v8  ;;  %v1179_v23 = vld [vmem:[%s1368_s0 + $0x9] sm:$0xff]  ;;  %v1204_v32 = vld [vmem:[%s1368_s0 + $0x19] sm:$0xff]  ;;  %v1209_v33 = vld [vmem:[%s1368_s0 + $0x21] sm:$0xff] }
   0xb   :  { %892 = vmatpush3.bf16.msra.mxu0 %v1015_v7  ;;  %v40_v24 = vpack.c.bf16 %v1179_v23, %v1174_v22  ;;  %v36_v26 = vld [vmem:[%s1368_s0 + $0xa] sm:$0xff]  ;;  %v37_v34 = vld [vmem:[%s1368_s0 + $0x1a] sm:$0xff]  ;;  %v38_v35 = vld [vmem:[%s1368_s0 + $0x22] sm:$0xff]  ;;  %v43_v37 = vpack.c.bf16 %v1209_v33, %v1204_v32 }
   0xc   :  { %893 = vmatprep.subr.bf16.mxu0 %v1017_v9  ;;  %v41_v28 = vpack.c.bf16 %v36_v26, %v35_v25  ;;  %v28_v31 = vld [vmem:[%s1368_s0 + $0x8] sm:$0xff]  ;;  %v44_v38 = vpack.c.bf16 %v38_v35, %v37_v34  ;;  %v29_v39 = vld [vmem:[%s1368_s0 + $0x18] sm:$0xff]  ;;  %v30_v40 = vld [vmem:[%s1368_s0 + $0x20] sm:$0xff]  ;;  %s1060_s0 = smov 8  }
   0xd   :  { %968 = vmatpush3.bf16.msra.mxu1 %v1016_v8  ;;  %269 = vmatprep.mubr.bf16.mxu0 %v40_v24  ;;  %v39_v36 = vpack.c.bf16 %v28_v31, %v27_v30  ;;  %v42_v41 = vpack.c.bf16 %v30_v40, %v29_v39 }
   0xe   :  { %969 = vmatprep.subr.bf16.mxu1 %v1019_v11  ;;  %979 = vmatprep.mubr.bf16.mxu1 %v41_v28 }
   0xf   :  { %894 = vmatpush3.bf16.msra.mxu0 %v1018_v10 }
  0x10   :  { %895 = vmatprep.subr.bf16.mxu0 %v1020_v12 }
  0x11   :  { %970 = vmatpush3.bf16.msra.mxu1 %v1019_v11 }
  0x12   :  { %971 = vmatprep.subr.bf16.mxu1 %v1022_v13 }
  0x13   :  { %896 = vmatpush3.bf16.msra.mxu0 %v1021_v14 }
  0x14   :  { %897 = vmatprep.subr.bf16.mxu0 %v1023_v15 }
  0x15   :  { %972 = vmatpush3.bf16.msra.mxu1 %v1022_v13  ;;  %v359_v13 = vlaneseq }
  0x16   :  { %973 = vmatprep.subr.bf16.mxu1 %v1025_v16 }
  0x17   :  { %898 = vmatpush3.bf16.msra.mxu0 %v1024_v17  ;;  %v360_v14 = vshrl.u32 %v359_v13, 7 }
  0x18   :  { %899 = vmatprep.subr.bf16.mxu0 %v1026_v18 }
  0x19   :  { %974 = vmatpush3.bf16.msra.mxu1 %v1025_v16  ;;  %v1229_v16 = vsub.s32 0, %v360_v14 }
  0x1a   :  { %975 = vmatprep.subr.bf16.mxu1 %v1028_v19 }
  0x1b   :  { %900 = vmatpush3.bf16.msra.mxu0 %v1027_v20 }
  0x1c   :  { %901 = vmatprep.subr.bf16.mxu0 %v1029_v21 }
  0x1d   :  { %976 = vmatpush3.bf16.msra.mxu1 %v1028_v19 }
  0x1e   :  { %977 = vmatprep.subr.bf16.mxu1 %v1031_v27 }
  0x1f   :  { %902 = vmatpush3.bf16.msra.mxu0 %v1030_v29 }
  0x21   :  { %978 = vmatpush3.bf16.msra.mxu1 %v1031_v27 }
  0x22   :  { %270 = vmatmul.mubr.bf16.vlgmr.msra.gmra.mrb[0].mxu0 %v39_v36 }
  0x23   :  { %277 = vmatprep.mubr.bf16.mxu0 %v43_v37 }
  0x24   :  { %980 = vmatmul.mubr.bf16.vlgmr.msra.gmra.mrb[0].mxu1 %v44_v38 }
  0x2a   :  { %278 = vmatmul.mubr.bf16.gmra.mrb[4].mxu0 %v42_v41 }
  0xf5   :  { %v903_v42 = vpop.f32.mrb[0].mxu0 }
  0xf6   :  { %v904_v43 = vpop.f32.mrb[1].mxu0 }
  0xf7   :  { %v905_v44 = vadd.f32 %v904_v43, %v903_v42  ;;  %v906_v45 = vpop.f32.mrb[2].mxu0  ;;  %v981_v46 = vpop.f32.mrb[0].mxu1 }
  0xf8   :  { %v907_v47 = vpop.f32.mrb[3].mxu0  ;;  %v320_v48 = vpop.f32.mrb[1].mxu1 }
  0xf9   :  { %v908_v49 = vadd.f32 %v907_v47, %v906_v45  ;;  %v321_v50 = vadd.f32 %v905_v44, %v320_v48  ;;  %v982_v51 = vpop.f32.mrb[2].mxu1  ;;  %v1032_v45 = vld [vmem:[%s1369_s2 + $0x40] sm:$0xff]   ;;  %v1035_v48 = vld [vmem:[%s1369_s2 + $0x48] sm:$0xff]  }
  0xfa   :  { %v323_v52 = vpop.f32.mrb[3].mxu1  ;;  %925 = vmatprep.subr.bf16.mxu0 %v1032_v45  ;;  %v1034_v47 = vld [vmem:[%s1369_s2] sm:$0xff]  }
  0xfb   :  { %v324_v53 = vadd.f32 %v908_v49, %v323_v52  ;;  %926 = vmatpush3.bf16.msra.mxu0 %v1034_v47  ;;  %v1036_v49 = vld [vmem:[%s1369_s2 + $0x88] sm:$0xff]  }
  0xfc   :  { %927 = vmatprep.subr.bf16.mxu0 %v1035_v48 }
  0xfd   :  { %v909_v54 = vpop.f32.mrb[4].mxu0  ;;  %v337_v59 = vadd.f32 %v324_v53, %v321_v50 }
  0xfe   :  { %v910_v55 = vpop.f32.mrb[5].mxu0 }
  0xff   :  { %v911_v56 = vadd.f32 %v910_v55, %v909_v54  ;;  %v912_v57 = vpop.f32.mrb[6].mxu0  ;;  %v1039_v54 = vld [vmem:[%s1369_s2 + $0x90] sm:$0xff]  }
 0x100   :  { %v913_v58 = vpop.f32.mrb[7].mxu0  ;;  %v1040_v55 = vld [vmem:[%s1369_s2 + $0x10] sm:$0xff]  }
 0x101   :  { %v329_v60 = vadd.f32 %v981_v46, %v911_v56  ;;  %v914_v61 = vadd.f32 %v913_v58, %v912_v57  ;;  %v1033_v46 = vld [vmem:[%s1369_s2 + $0x80] sm:$0xff]   ;;  %v1041_v56 = vld [vmem:[%s1369_s2 + $0x58] sm:$0xff]  }
 0x102   :  { %983 = vmatprep.subr.bf16.mxu1 %v1033_v46  ;;  %v1042_v57 = vld [vmem:[%s1369_s2 + $0x98] sm:$0xff]  }
 0x103   :  { %v338_v62 = vadd.f32 %v337_v59, %v329_v60  ;;  %v332_v63 = vadd.f32 %v982_v51, %v914_v61  ;;  %984 = vmatpush3.bf16.msra.mxu1 %v1033_v46  ;;  %v1043_v58 = vld [vmem:[%s1369_s2 + $0x18] sm:$0xff]   ;;  %v1044_v59 = vld [vmem:[%s1369_s2 + $0x60] sm:$0xff]  }
 0x104   :  { %985 = vmatprep.subr.bf16.mxu1 %v1036_v49  ;;  %v1046_v61 = vld [vmem:[%s1369_s2 + $0x20] sm:$0xff]  }
 0x105   :  { %v339_v0 = vadd.f32 %v338_v62, %v332_v63  ;;  %v1047_v62 = vld [vmem:[%s1369_s2 + $0x68] sm:$0xff]  }
 0x107   :  { %v340_v1 = vrot.slane %v339_v0, 4  ;;  %986 = vmatpush3.bf16.msra.mxu1 %v1036_v49 }
 0x108   :  { %987 = vmatprep.subr.bf16.mxu1 %v1039_v54 }
 0x109   :  { %v341_v2 = vadd.f32 %v340_v1, %v339_v0  ;;  %v1049_v0 = vld [vmem:[%s1369_s2 + $0x28] sm:$0xff]   ;;  %v1050_v1 = vld [vmem:[%s1369_s2 + $0x70] sm:$0xff]  }
 0x10b   :  { %v342_v3 = vrot.slane %v341_v2, 2  ;;  %988 = vmatpush3.bf16.msra.mxu1 %v1039_v54 }
 0x10c   :  { %989 = vmatprep.subr.bf16.mxu1 %v1042_v57 }
 0x10d   :  { %v343_v4 = vadd.f32 %v342_v3, %v341_v2  ;;  %v1051_v2 = vld [vmem:[%s1369_s2 + $0xb0] sm:$0xff]  }
 0x10e   :  { %v1052_v3 = vld [vmem:[%s1369_s2 + $0x30] sm:$0xff]  }
 0x10f   :  { %v344_v5 = vrot.slane %v343_v4, 1  ;;  %990 = vmatpush3.bf16.msra.mxu1 %v1042_v57 }
 0x111   :  { %v345_v6 = vadd.f32 %v344_v5, %v343_v4  ;;  %v1064_v4 = vmov 0.0   ;;  %v1053_v5 = vld [vmem:[%s1369_s2 + $0x78] sm:$0xff]  }
 0x112   :  { %422 = vst [vmem:[#allocation2 + $0x11] sm:$0x1] %v1064_v4  ;;  %420 = vst [vmem:[#allocation2] sm:$0x1] %v1064_v4 }
 0x113   :  { %346 = vrot.lane.b32.xlu0 %v345_v6, %s1060_s0  ;;  %421 = vst [vmem:[#allocation2 + $0x18] sm:$0x1] %v1064_v4  ;;  %423 = vst [vmem:[#allocation2 + $0x29] sm:$0x1] %v1064_v4 }
 0x185   :  { %v347_v7 = vpop.permute.xlu0 %346 }
 0x186   :  { %v348_v8 = vadd.f32 %v347_v7, %v345_v6  ;;  %v1054_v6 = vld [vmem:[%s1369_s2 + $0xb8] sm:$0xff]  }
 0x187   :  { %v1055_v7 = vld [vmem:[%s1369_s2 + $0x38] sm:$0xff]  }
 0x188   :  { %349 = vrot.lane.b32.xlu0 %v348_v8, %s1061_s26 }
 0x1fa   :  { %v350_v9 = vpop.permute.xlu0 %349 }
 0x1fb   :  { %v351_v10 = vadd.f32 %v350_v9, %v348_v8 }
 0x1fd   :  { %352 = vrot.lane.b32.xlu1 %v351_v10, %s1062_s27 }
 0x26f   :  { %v353_v11 = vpop.permute.xlu1 %352 }
 0x270   :  { %v354_v12 = vadd.f32 %v353_v11, %v351_v10 }
 0x272   :  { %355 = vrot.lane.b32.xlu1 %v354_v12, %s1063_s28 }
 0x2e4   :  { %v356_v15 = vpop.permute.xlu1 %355 }
 0x2e5   :  { %v357_v17 = vadd.f32 %v356_v15, %v354_v12  ;;  %v335_v12 = vld [vmem:[%s1370_s3] sm:$0x1] }
 0x2e7   :  { %v358_v18 = vmul.f32 0.001953125, %v357_v17  ;;  %v861_v17 = vld [vmem:[%s1371_s4] ss:$0 sm:$0xff] }
 0x2e9   :  { %v362_v19 = vrot.slane %v358_v18, %v1229_v16 }
 0x2eb   :  { %v1232_v20 = vsub.f32 %v321_v50, %v362_v19  ;;  %v1234_v21 = vsub.f32 %v324_v53, %v362_v19  ;;  %v1236_v24 = vsub.f32 %v329_v60, %v362_v19  ;;  %v1238_v25 = vsub.f32 %v332_v63, %v362_v19  ;;  %v1037_v50 = vld [vmem:[%s1369_s2 + $0x8] sm:$0xff]   ;;  %v1038_v53 = vld [vmem:[%s1369_s2 + $0x50] sm:$0xff]   ;;  %v1045_v60 = vld [vmem:[%s1369_s2 + $0xa0] sm:$0xff]  }
 0x2ec   :  { %928 = vmatpush3.bf16.msra.mxu0 %v1037_v50  ;;  %991 = vmatprep.subr.bf16.mxu1 %v1045_v60  ;;  %v1048_v63 = vld [vmem:[%s1369_s2 + $0xa8] sm:$0xff]  }
 0x2ed   :  { %v367_v26 = vmul.f32 %v1232_v20, %v1232_v20  ;;  %v368_v27 = vmul.f32 %v1234_v21, %v1234_v21  ;;  %v369_v28 = vmul.f32 %v1236_v24, %v1236_v24  ;;  %v370_v30 = vmul.f32 %v1238_v25, %v1238_v25  ;;  %929 = vmatprep.subr.bf16.mxu0 %v1038_v53 }
 0x2ee   :  { %992 = vmatpush3.bf16.msra.mxu1 %v1045_v60 }
 0x2ef   :  { %v371_v29 = vadd.f32 %v368_v27, %v367_v26  ;;  %993 = vmatprep.subr.bf16.mxu1 %v1048_v63 }
 0x2f0   :  { %930 = vmatpush3.bf16.msra.mxu0 %v1040_v55 }
 0x2f1   :  { %v372_v31 = vadd.f32 %v371_v29, %v369_v28  ;;  %931 = vmatprep.subr.bf16.mxu0 %v1041_v56 }
 0x2f2   :  { %994 = vmatpush3.bf16.msra.mxu1 %v1048_v63 }
 0x2f3   :  { %v373_v34 = vadd.f32 %v372_v31, %v370_v30  ;;  %995 = vmatprep.subr.bf16.mxu1 %v1051_v2 }
 0x2f4   :  { %932 = vmatpush3.bf16.msra.mxu0 %v1043_v58 }
 0x2f5   :  { %v374_v35 = vrot.slane %v373_v34, 4  ;;  %933 = vmatprep.subr.bf16.mxu0 %v1044_v59 }
 0x2f6   :  { %996 = vmatpush3.bf16.msra.mxu1 %v1051_v2 }
 0x2f7   :  { %v375_v36 = vadd.f32 %v374_v35, %v373_v34  ;;  %997 = vmatprep.subr.bf16.mxu1 %v1054_v6 }
 0x2f8   :  { %934 = vmatpush3.bf16.msra.mxu0 %v1046_v61 }
 0x2f9   :  { %v376_v37 = vrot.slane %v375_v36, 2  ;;  %935 = vmatprep.subr.bf16.mxu0 %v1047_v62 }
 0x2fa   :  { %998 = vmatpush3.bf16.msra.mxu1 %v1054_v6 }
 0x2fb   :  { %v377_v38 = vadd.f32 %v376_v37, %v375_v36 }
 0x2fc   :  { %936 = vmatpush3.bf16.msra.mxu0 %v1049_v0 }
 0x2fd   :  { %v378_v39 = vrot.slane %v377_v38, 1  ;;  %937 = vmatprep.subr.bf16.mxu0 %v1050_v1 }
 0x2ff   :  { %v379_v40 = vadd.f32 %v378_v39, %v377_v38 }
 0x300   :  { %938 = vmatpush3.bf16.msra.mxu0 %v1052_v3 }
 0x301   :  { %380 = vrot.lane.b32.xlu0 %v379_v40, %s1060_s0  ;;  %939 = vmatprep.subr.bf16.mxu0 %v1053_v5 }
 0x304   :  { %940 = vmatpush3.bf16.msra.mxu0 %v1055_v7 }
 0x373   :  { %v381_v41 = vpop.permute.xlu0 %380 }
 0x374   :  { %v382_v42 = vadd.f32 %v381_v41, %v379_v40 }
 0x376   :  { %383 = vrot.lane.b32.xlu1 %v382_v42, %s1061_s26 }
 0x3e8   :  { %v384_v43 = vpop.permute.xlu1 %383 }
 0x3e9   :  { %v385_v44 = vadd.f32 %v384_v43, %v382_v42 }
 0x3eb   :  { %386 = vrot.lane.b32.xlu0 %v385_v44, %s1062_s27 }
 0x45d   :  { %v387_v51 = vpop.permute.xlu0 %386 }
 0x45e   :  { %v388_v52 = vadd.f32 %v387_v51, %v385_v44 }
 0x460   :  { %389 = vrot.lane.b32.xlu1 %v388_v52, %s1063_s28 }
 0x4d2   :  { %v390_v8 = vpop.permute.xlu1 %389 }
 0x4d3   :  { %v391_v9 = vadd.f32 %v390_v8, %v388_v52 }
 0x4d5   :  { %v392_v10 = vmul.f32 0.001953125, %v391_v9 }
 0x4d7   :  { %v393_v11 = vadd.f32 1e-05, %v392_v10 }
 0x4d9   :  { %1056 = vrsqrt.f32 %v393_v11 }
 0x4e3   :  { %v1057_v13 = vpop.eup %1056 }
 0x4e4   :  { %v395_v14 = vmul.f32 %v1057_v13, %v335_v12 }
 0x4e6   :  { %v400_v15 = vrot.slane %v395_v14, %v1229_v16 }
 0x4e8   :  { %v402_v18 = vmul.f32 %v400_v15, %v1232_v20  ;;  %v403_v19 = vmul.f32 %v400_v15, %v1234_v21  ;;  %v404_v26 = vmul.f32 %v400_v15, %v1236_v24  ;;  %v405_v27 = vmul.f32 %v400_v15, %v1238_v25 }
 0x4ea   :  { %v412_v28 = vadd.f32 %v861_v17, %v402_v18  ;;  %v413_v29 = vadd.f32 %v861_v17, %v403_v19  ;;  %v414_v30 = vadd.f32 %v861_v17, %v404_v26  ;;  %v415_v31 = vadd.f32 %v861_v17, %v405_v27 }
 0x4ec   :  { %v416_v34 = vmax.f32 %v412_v28, 0.0  ;;  %v417_v35 = vmax.f32 %v413_v29, 0.0  ;;  %v418_v36 = vmax.f32 %v414_v30, 0.0  ;;  %v419_v37 = vmax.f32 %v415_v31, 0.0 }
 0x4ee   :  { %424 = vst [vmem:[#allocation2 + $0x1] sm:$0xff] %v416_v34  ;;  %425 = vst [vmem:[#allocation2 + $0x9] sm:$0xff] %v417_v35  ;;  %v441_v38 = vpack.c.bf16 %v417_v35, %v416_v34  ;;  %v444_v44 = vpack.c.bf16 %v419_v37, %v418_v36 }
 0x4ef   :  { %426 = vst [vmem:[#allocation2 + $0x19] sm:$0xff] %v418_v36  ;;  %427 = vst [vmem:[#allocation2 + $0x21] sm:$0xff] %v419_v37 }
 0x4f0   :  { %670 = vmatprep.mubr.bf16.mxu0 %v441_v38 }
 0x4f5   :  { %v436_v20 = vld [vmem:[#allocation2 + $0x2] sm:$0xff]  ;;  %v437_v21 = vld [vmem:[#allocation2 + $0xa] sm:$0xff] }
 0x4f6   :  { %v428_v39 = vld [vmem:[#allocation2] sm:$0xff]  ;;  %v442_v24 = vpack.c.bf16 %v437_v21, %v436_v20  ;;  %v429_v40 = vld [vmem:[#allocation2 + $0x8] sm:$0xff]  ;;  %v430_v45 = vld [vmem:[#allocation2 + $0x18] sm:$0xff] }
 0x4f7   :  { %v438_v25 = vld [vmem:[#allocation2 + $0x1a] sm:$0xff]  ;;  %v439_v41 = vld [vmem:[#allocation2 + $0x22] sm:$0xff]  ;;  %v440_v42 = vpack.c.bf16 %v429_v40, %v428_v39 }
 0x4f8   :  { %v445_v43 = vpack.c.bf16 %v439_v41, %v438_v25  ;;  %999 = vmatprep.mubr.bf16.mxu1 %v442_v24  ;;  %v431_v46 = vld [vmem:[#allocation2 + $0x20] sm:$0xff] }
 0x4f9   :  { %671 = vmatmul.mubr.bf16.vlgmr.msra.gmra.mrb[8].mxu0 %v440_v42  ;;  %v443_v47 = vpack.c.bf16 %v431_v46, %v430_v45 }
 0x4fa   :  { %1000 = vmatmul.mubr.bf16.vlgmr.msra.gmra.mrb[4].mxu1 %v445_v43  ;;  %678 = vmatprep.mubr.bf16.mxu0 %v444_v44 }
 0x501   :  { %679 = vmatmul.mubr.bf16.gmra.mrb[12].mxu0 %v443_v47 }
 0x5cc   :  { %v941_v48 = vpop.f32.mrb[8].mxu0 }
 0x5cd   :  { %v1001_v49 = vpop.f32.mrb[4].mxu1  ;;  %v942_v50 = vpop.f32.mrb[9].mxu0 }
 0x5ce   :  { %v721_v51 = vpop.f32.mrb[5].mxu1  ;;  %v943_v52 = vadd.f32 %v942_v50, %v941_v48  ;;  %v944_v53 = vpop.f32.mrb[10].mxu0 }
 0x5cf   :  { %v1002_v54 = vpop.f32.mrb[6].mxu1  ;;  %v945_v55 = vpop.f32.mrb[11].mxu0 }
 0x5d0   :  { %v724_v56 = vpop.f32.mrb[7].mxu1  ;;  %v722_v57 = vadd.f32 %v943_v52, %v721_v51  ;;  %v946_v58 = vadd.f32 %v945_v55, %v944_v53  ;;  %v736_v55 = vld [vmem:[%s1372_s5] sm:$0x1] }
 0x5d2   :  { %v725_v59 = vadd.f32 %v946_v58, %v724_v56 }
 0x5d4   :  { %v947_v60 = vpop.f32.mrb[12].mxu0  ;;  %v738_v1 = vadd.f32 %v725_v59, %v722_v57 }
 0x5d5   :  { %v948_v61 = vpop.f32.mrb[13].mxu0 }
 0x5d6   :  { %v949_v62 = vadd.f32 %v948_v61, %v947_v60  ;;  %v950_v63 = vpop.f32.mrb[14].mxu0 }
 0x5d7   :  { %v951_v0 = vpop.f32.mrb[15].mxu0 }
 0x5d8   :  { %v730_v2 = vadd.f32 %v1001_v49, %v949_v62  ;;  %v952_v3 = vadd.f32 %v951_v0, %v950_v63 }
 0x5da   :  { %v739_v4 = vadd.f32 %v738_v1, %v730_v2  ;;  %v733_v5 = vadd.f32 %v1002_v54, %v952_v3 }
 0x5dc   :  { %v740_v6 = vadd.f32 %v739_v4, %v733_v5 }
 0x5de   :  { %v741_v7 = vrot.slane %v740_v6, 4 }
 0x5e0   :  { %v742_v8 = vadd.f32 %v741_v7, %v740_v6 }
 0x5e2   :  { %v743_v9 = vrot.slane %v742_v8, 2 }
 0x5e4   :  { %v744_v10 = vadd.f32 %v743_v9, %v742_v8 }
 0x5e6   :  { %v745_v11 = vrot.slane %v744_v10, 1 }
 0x5e8   :  { %v746_v12 = vadd.f32 %v745_v11, %v744_v10 }
 0x5ea   :  { %747 = vrot.lane.b32.xlu0 %v746_v12, %s1060_s0 }
 0x65c   :  { %v748_v13 = vpop.permute.xlu0 %747 }
 0x65d   :  { %v749_v14 = vadd.f32 %v748_v13, %v746_v12 }
 0x65f   :  { %750 = vrot.lane.b32.xlu1 %v749_v14, %s1061_s26 }
 0x6d1   :  { %v751_v15 = vpop.permute.xlu1 %750 }
 0x6d2   :  { %v752_v17 = vadd.f32 %v751_v15, %v749_v14 }
 0x6d4   :  { %753 = vrot.lane.b32.xlu0 %v752_v17, %s1062_s27 }
 0x746   :  { %v754_v18 = vpop.permute.xlu0 %753 }
 0x747   :  { %v755_v19 = vadd.f32 %v754_v18, %v752_v17 }
 0x749   :  { %756 = vrot.lane.b32.xlu1 %v755_v19, %s1063_s28 }
 0x7bb   :  { %v757_v26 = vpop.permute.xlu1 %756 }
 0x7bc   :  { %v758_v27 = vadd.f32 %v757_v26, %v755_v19 }
 0x7be   :  { %v759_v28 = vmul.f32 0.001953125, %v758_v27 }
 0x7c0   :  { %v763_v29 = vrot.slane %v759_v28, %v1229_v16 }
 0x7c2   :  { %v764_v30 = vsub.f32 %v722_v57, %v763_v29  ;;  %v765_v31 = vsub.f32 %v725_v59, %v763_v29  ;;  %v766_v34 = vsub.f32 %v730_v2, %v763_v29  ;;  %v767_v35 = vsub.f32 %v733_v5, %v763_v29  ;;  %v886_v59 = vld [vmem:[%s1373_s6] ss:$0 sm:$0xff] }
 0x7c4   :  { %v768_v36 = vmul.f32 %v764_v30, %v764_v30  ;;  %v769_v37 = vmul.f32 %v765_v31, %v765_v31  ;;  %v770_v38 = vmul.f32 %v766_v34, %v766_v34  ;;  %v771_v21 = vmul.f32 %v767_v35, %v767_v35 }
 0x7c6   :  { %v772_v20 = vadd.f32 %v769_v37, %v768_v36 }
 0x7c8   :  { %v773_v39 = vadd.f32 %v772_v20, %v770_v38 }
 0x7ca   :  { %v774_v24 = vadd.f32 %v773_v39, %v771_v21 }
 0x7cc   :  { %v775_v40 = vrot.slane %v774_v24, 4 }
 0x7ce   :  { %v776_v25 = vadd.f32 %v775_v40, %v774_v24 }
 0x7d0   :  { %v777_v41 = vrot.slane %v776_v25, 2 }
 0x7d2   :  { %v778_v42 = vadd.f32 %v777_v41, %v776_v25 }
 0x7d4   :  { %v779_v43 = vrot.slane %v778_v42, 1 }
 0x7d6   :  { %v780_v44 = vadd.f32 %v779_v43, %v778_v42 }
 0x7d8   :  { %781 = vrot.lane.b32.xlu0 %v780_v44, %s1060_s0 }
 0x84a   :  { %v782_v45 = vpop.permute.xlu0 %781 }
 0x84b   :  { %v783_v46 = vadd.f32 %v782_v45, %v780_v44 }
 0x84d   :  { %784 = vrot.lane.b32.xlu1 %v783_v46, %s1061_s26 }
 0x8bf   :  { %v785_v47 = vpop.permute.xlu1 %784 }
 0x8c0   :  { %v786_v48 = vadd.f32 %v785_v47, %v783_v46 }
 0x8c2   :  { %787 = vrot.lane.b32.xlu0 %v786_v48, %s1062_s27 }
 0x934   :  { %v788_v49 = vpop.permute.xlu0 %787 }
 0x935   :  { %v789_v50 = vadd.f32 %v788_v49, %v786_v48 }
 0x937   :  { %790 = vrot.lane.b32.xlu1 %v789_v50, %s1063_s28 }
 0x9a9   :  { %v791_v51 = vpop.permute.xlu1 %790 }
 0x9aa   :  { %v792_v52 = vadd.f32 %v791_v51, %v789_v50 }
 0x9ac   :  { %v793_v53 = vmul.f32 0.001953125, %v792_v52 }
 0x9ae   :  { %v794_v54 = vadd.f32 1e-05, %v793_v53 }
 0x9b0   :  { %1058 = vrsqrt.f32 %v794_v54 }
 0x9ba   :  { %v1059_v56 = vpop.eup %1058 }
 0x9bb   :  { %v796_v57 = vmul.f32 %v1059_v56, %v736_v55 }
 0x9bd   :  { %v801_v58 = vrot.slane %v796_v57, %v1229_v16 }
 0x9bf   :  { %v803_v60 = vmul.f32 %v801_v58, %v764_v30  ;;  %v804_v61 = vmul.f32 %v801_v58, %v765_v31  ;;  %v805_v62 = vmul.f32 %v801_v58, %v766_v34  ;;  %v806_v63 = vmul.f32 %v801_v58, %v767_v35 }
 0x9c1   :  { %v813_v0 = vadd.f32 %v886_v59, %v803_v60  ;;  %v814_v1 = vadd.f32 %v886_v59, %v804_v61  ;;  %v815_v2 = vadd.f32 %v886_v59, %v805_v62  ;;  %v816_v3 = vadd.f32 %v886_v59, %v806_v63 }
 0x9c3   :  { %v821_v4 = vadd.f32 %v813_v0, %v1174_v22  ;;  %v822_v5 = vadd.f32 %v814_v1, %v1179_v23  ;;  %v823_v6 = vadd.f32 %v815_v2, %v1204_v32  ;;  %v824_v16 = vadd.f32 %v816_v3, %v1209_v33 }
 0x9c5   :  { %v825_v7 = vmax.f32 %v821_v4, 0.0  ;;  %v826_v8 = vmax.f32 %v822_v5, 0.0  ;;  %v827_v9 = vmax.f32 %v823_v6, 0.0  ;;  %v828_v10 = vmax.f32 %v824_v16, 0.0 }
 0x9c7   :  { %829 = vst [vmem:[%s1374_s7] sm:$0xff] %v825_v7  ;;  %830 = vst [vmem:[%s1374_s7 + $0x8] sm:$0xff] %v826_v8 }
 0x9c8   :  { %831 = vst [vmem:[%s1374_s7 + $0x10] sm:$0xff] %v827_v9  ;;  %832 = vst [vmem:[%s1374_s7 + $0x18] sm:$0xff] %v828_v10 }

</bundles_post_ra>
